<compile_context>
chip_gen: v5e
topology: v5e:2x2
jax: 0.10.0
libtpu: 0.0.40
codegen_flags: <defaults>
</compile_context>

<pallas_src>
import jax
import jax.numpy as jnp
from jax import lax
from jax.experimental import pallas as pl
from jax.experimental.pallas import tpu as pltpu


def _round_up(x, m):
    return (x + m - 1) // m * m


# ---------------------------------------------------------------------------
# Pass 1: per-row inverse L2 norms   (N, D) -> (N, 1)
# ---------------------------------------------------------------------------
def _row_invnorm_kernel(x_ref, inv_ref):
    x = x_ref[...].astype(jnp.float32)
    sq = jnp.sum(x * x, axis=1, keepdims=True)
    # F.normalize: x / max(||x||, 1e-12)  ==  x * rsqrt(max(||x||^2, 1e-24))
    inv_ref[...] = lax.rsqrt(jnp.maximum(sq, 1e-24))


# ---------------------------------------------------------------------------
# Pass 2: tiled Gram matrix + masked reductions -> scalar loss
# ---------------------------------------------------------------------------
def _gram_loss_kernel(params_ref,      # SMEM (1, 3): [gamma, pos_cnt, neg_cnt]
                      lab_col_ref,     # (T, 1)  int32, row-block labels
                      lab_row_ref,     # (1, T)  int32, col-block labels
                      feat_i_ref,      # (T, Dp) features, row block
                      feat_j_ref,      # (T, Dp) features, col block
                      inv_i_ref,       # (T, 1)  f32 inverse norms, row block
                      inv_j_ref,       # (T, 1)  f32 inverse norms, col block
                      out_ref,         # SMEM (1, 1) f32 loss
                      acc_ref):        # SMEM scratch (2,) f32: pos_sum, neg_sum
    i = pl.program_id(0)
    j = pl.program_id(1)

    @pl.when((i == 0) & (j == 0))
    def _init():
        acc_ref[0] = 0.0
        acc_ref[1] = 0.0

    # Normalize both operand tiles with the precomputed inverse norms (cheap
    # broadcast multiply; no per-tile sqrt/divide).
    xi = feat_i_ref[...].astype(jnp.float32) * inv_i_ref[...]
    xj = feat_j_ref[...].astype(jnp.float32) * inv_j_ref[...]

    # (T, T) cosine-similarity tile on the MXU; contract last dim with last
    # dim so no transpose of xj is needed.
    dot = lax.dot_general(xi, xj,
                          dimension_numbers=(((1,), (1,)), ((), ())),
                          preferred_element_type=jnp.float32)

    # Same-class mask from the pre-shaped label column / row blocks.
    same = lab_col_ref[...] == lab_row_ref[...]            # (T, T) bool

    pos_part = jnp.sum(jnp.where(same, dot, 0.0))          # includes diagonal
    neg_part = jnp.sum(jnp.where(same, 0.0, jnp.abs(dot)))

    acc_ref[0] += pos_part
    acc_ref[1] += neg_part

    # The diagonal only exists in tiles with i == j: subtract its contribution
    # there and skip the iota/eye work on all off-diagonal tiles.
    @pl.when(i == j)
    def _sub_diag():
        t0, t1 = dot.shape
        row = lax.broadcasted_iota(jnp.int32, (t0, t1), 0)
        col = lax.broadcasted_iota(jnp.int32, (t0, t1), 1)
        acc_ref[0] -= jnp.sum(jnp.where(row == col, dot, 0.0))

    @pl.when((i == pl.num_programs(0) - 1) & (j == pl.num_programs(1) - 1))
    def _finalize():
        gamma = params_ref[0, 0]
        pos_cnt = params_ref[0, 1]
        neg_cnt = params_ref[0, 2]
        pos_mean = acc_ref[0] / (pos_cnt + 1e-6)
        neg_mean = acc_ref[1] / (neg_cnt + 1e-6)
        out_ref[0, 0] = 1.0 - pos_mean + gamma * neg_mean


# ---------------------------------------------------------------------------
# Wrapper
# ---------------------------------------------------------------------------
def loss_op_pallas(features, labels, gamma=0.5, tile=256):
    """features: (N, D) float, labels: (N,) int -> scalar float32 loss."""
    n, d = features.shape

    # --- tiling / padding ---------------------------------------------------
    if n <= tile:
        t = _round_up(max(n, 8), 8)      # single tile covering the batch
    else:
        t = tile                         # multiple of 128 (MXU / lane aligned)
    np_ = _round_up(n, t)
    dp = _round_up(d, 128)
    g = np_ // t

    feats_p = jnp.pad(features.astype(jnp.float32),
                      ((0, np_ - n), (0, dp - d)))
    lab_col = jnp.pad(labels.astype(jnp.int32).reshape(n, 1),
                      ((0, np_ - n), (0, 0)))
    lab_row = lab_col.reshape(1, np_)

    # --- analytic pair counts from the (unpadded) label multiset ------------
    # sum_k c_k^2 via sort + searchsorted: O(N log N), no N^2 host work.
    flat = labels.astype(jnp.int32)
    s = jnp.sort(flat)
    cls_sz = (jnp.searchsorted(s, flat, side='right')
              - jnp.searchsorted(s, flat, side='left')).astype(jnp.float32)
    sum_c2 = jnp.sum(cls_sz)                            # = sum_k c_k^2
    pos_cnt = sum_c2 - jnp.float32(n)                   # sum_k c_k (c_k - 1)
    neg_cnt = jnp.float32(n) * jnp.float32(n) - sum_c2
    params = jnp.stack([jnp.float32(gamma), pos_cnt, neg_cnt]).reshape(1, 3)

    # --- pass 1: per-row inverse norms ---------------------------------------
    inv = pl.pallas_call(
        _row_invnorm_kernel,
        out_shape=jax.ShapeDtypeStruct((np_, 1), jnp.float32),
        grid=(g,),
        in_specs=[pl.BlockSpec((t, dp), lambda r: (r, 0))],
        out_specs=pl.BlockSpec((t, 1), lambda r: (r, 0)),
        compiler_params=pltpu.CompilerParams(
            dimension_semantics=("parallel",)),
    )(feats_p)

    # --- pass 2: tiled Gram matrix + masked reductions -----------------------
    # Working set: double-buffered (t, dp) feature tiles for both operands,
    # their normalized copies, and the (t, t) dot tile + where temporaries.
    vmem_bytes = (2 * 2 * t * dp * 4) + (2 * t * dp * 4) + (6 * t * t * 4) + (2 << 20)
    vmem_limit = int(min(max(vmem_bytes, 32 * 1024 * 1024), 64 * 1024 * 1024))

    cost = pl.CostEstimate(
        flops=int(2 * np_ * np_ * dp + 8 * np_ * np_),
        transcendentals=0,
        bytes_accessed=int(4 * np_ * dp * (g + 1) + 8 * np_ * (g + 1) + 16),
    )

    # TODO(synk): on v7x, emit per-row-block partial sums with a "parallel"
    # outer grid axis so both TensorCores share the work; kept a single
    # sequential accumulator here for cross-generation correctness.
    out = pl.pallas_call(
        _gram_loss_kernel,
        out_shape=jax.ShapeDtypeStruct((1, 1), jnp.float32),
        grid=(g, g),
        in_specs=[
            pl.BlockSpec(memory_space=pltpu.SMEM),            # params (gamma, counts)
            pl.BlockSpec((t, 1), lambda i, j: (i, 0)),        # labels, row block
            pl.BlockSpec((1, t), lambda i, j: (0, j)),        # labels, col block
            pl.BlockSpec((t, dp), lambda i, j: (i, 0)),       # features, row tile
            pl.BlockSpec((t, dp), lambda i, j: (j, 0)),       # features, col tile
            pl.BlockSpec((t, 1), lambda i, j: (i, 0)),        # inv-norms, row tile
            pl.BlockSpec((t, 1), lambda i, j: (j, 0)),        # inv-norms, col tile
        ],
        out_specs=pl.BlockSpec((1, 1), lambda i, j: (0, 0),
                               memory_space=pltpu.SMEM),
        scratch_shapes=[pltpu.SMEM((2,), jnp.float32)],
        compiler_params=pltpu.CompilerParams(
            dimension_semantics=("arbitrary", "arbitrary"),
            vmem_limit_bytes=vmem_limit),
        cost_estimate=cost,
    )(params, lab_col, lab_row, feats_p, feats_p, inv, inv)
    return out[0, 0]


# ---------------------------------------------------------------------------
# Pure-JAX reference mirroring the PyTorch forward.
# ---------------------------------------------------------------------------
def loss_op_ref(features, labels, gamma=0.5):
    x = features / jnp.maximum(
        jnp.linalg.norm(features, axis=1, keepdims=True), 1e-12)
    lab = labels[:, None]
    mask = lab == lab.T
    eye = jnp.eye(mask.shape[0], dtype=bool)
    mask_pos = jnp.where(mask & (~eye), 1.0, 0.0)
    mask_neg = jnp.where(~mask, 1.0, 0.0)
    dot = x @ x.T
    pos_mean = jnp.sum(mask_pos * dot) / (jnp.sum(mask_pos) + 1e-6)
    neg_mean = jnp.sum(jnp.abs(mask_neg * dot)) / (jnp.sum(mask_neg) + 1e-6)
    return 1.0 - pos_mean + gamma * neg_mean


if __name__ == "__main__":
    key = jax.random.PRNGKey(0)
    kf, kl, kf2, kl2 = jax.random.split(key, 4)

    # Small case (matches the module's typical tiny batch) -> single tile.
    N, D = 8, 32
    features = jax.random.normal(kf, (N, D), dtype=jnp.float32)
    labels = jax.random.randint(kl, (N,), 0, 3, dtype=jnp.int32)

    loss = jax.block_until_ready(loss_op_pallas(features, labels, gamma=0.5))
    ref = loss_op_ref(features, labels, gamma=0.5)
    assert jnp.allclose(loss, ref, atol=1e-5, rtol=1e-5), (loss, ref)

    # Moderate case exercising the tiled grid (2x2 blocks) + N/D padding.
    N2, D2 = 300, 72
    features2 = jax.random.normal(kf2, (N2, D2), dtype=jnp.float32)
    labels2 = jax.random.randint(kl2, (N2,), 0, 5, dtype=jnp.int32)

    loss2 = jax.block_until_ready(loss_op_pallas(features2, labels2, gamma=0.5))
    ref2 = loss_op_ref(features2, labels2, gamma=0.5)
    assert jnp.allclose(loss2, ref2, atol=1e-4, rtol=1e-4), (loss2, ref2)

    print("KERNEL_OK")
</pallas_src>

<mosaic_0001>
module attributes {stable_mosaic.version = 11 : i64} {
  func.func @_row_invnorm_kernel(%arg0: i32, %arg1: memref<8x128xf32, #tpu.memory_space<vmem>>, %arg2: memref<8x1xf32, #tpu.memory_space<vmem>>) attributes {dimension_semantics = [#tpu.dimension_semantics<parallel>], iteration_bounds = array<i64: 1>, scalar_prefetch = 0 : i64, scratch_operands = 0 : i64, tpu.core_type = #tpu.core_type<tc>, window_params = [{transform_indices = @transform_0, window_bounds = array<i64: 8, 128>}, {transform_indices = @transform_1, window_bounds = array<i64: 8, 1>}]} {
    %c0 = arith.constant 0 : index
    %c0_0 = arith.constant 0 : index
    %0 = vector.load %arg1[%c0, %c0_0] : memref<8x128xf32, #tpu.memory_space<vmem>>, vector<8x128xf32>
    %1 = arith.mulf %0, %0 : vector<8x128xf32>
    %cst = arith.constant dense<0.000000e+00> : vector<8xf32>
    %2 = vector.multi_reduction <add>, %1, %cst [1] : vector<8x128xf32> to vector<8xf32>
    %3 = vector.shape_cast %2 : vector<8xf32> to vector<8x1xf32>
    %cst_1 = arith.constant 1.000000e-24 : f32
    %4 = vector.broadcast %cst_1 : f32 to vector<8x1xf32>
    %5 = arith.maximumf %3, %4 : vector<8x1xf32>
    %6 = math.rsqrt %5 : vector<8x1xf32>
    %c0_2 = arith.constant 0 : index
    %c0_3 = arith.constant 0 : index
    %7 = vector.load %arg2[%c0_2, %c0_3] : memref<8x1xf32, #tpu.memory_space<vmem>>, vector<8x1xf32>
    tpu.vector_store %arg2[%c0_2, %c0_3], %6 {strides = array<i32>} : memref<8x1xf32, #tpu.memory_space<vmem>>, vector<8x1xf32>,
    return
  }
  func.func @transform_0(%arg0: i32) -> (i32, i32) {
    %c0_i32 = arith.constant 0 : i32
    %c0_i32_0 = arith.constant 0 : i32
    return %arg0, %c0_i32 : i32, i32
  }
  func.func @transform_1(%arg0: i32) -> (i32, i32) {
    %c0_i32 = arith.constant 0 : i32
    %c0_i32_0 = arith.constant 0 : i32
    return %arg0, %c0_i32 : i32, i32
  }
}

</mosaic_0001>

<bundles_post_ra>
// kernel: tpu_custom_call.1
= control target key start
LH: loop header
LB: loop body
LE: loop exit
PB: predicated region body
PF: predicated region fallthrough
CT: control target
= control target key end

     0   :  { %6 = vsyncpa [#allocation3], 0  ;;  %s73_s9 = smov [#allocation2]   ;;  %s90_s0 = inlined_call_operand.hbm [shape: f32[8,128], index: 0, kind: input, shape index: {}]   ;;  %s91_s1 = inlined_call_operand.vmem [shape: f32[8,1], index: 1, kind: output, shape index: {}]  }
   0x1   :  { %s12_s8 = sshll.u32 %s90_s0, 4  ;;  %s14_s10 = sshll.u32 %s73_s9, 4  ;;  %s13_s8 = int_to_ptr.hbm [resolvable:$true] %s12_s8  ;;  %s15_s10 = int_to_ptr.vmem [resolvable:$true] %s14_s10 }
   0x2   :  { %17 = dma.hbm_to_vmem [thread:$0]  %s13_s8, 128, %s15_s10, [#allocation3]  }
   0x3   :  { %71 = dma.done.wait [#allocation3], 128  }
   0x4   :  { %72 = vsyncadd [#allocation3], 4294967168  ;;  %v22_v0 = vld [vmem:[#allocation2] sm:$0xff]  ;;  %vm37_vm2 = vcmask 7168  }
   0x5   :  { %v23_v1 = vmul.f32 %v22_v0, %v22_v0 }
   0x7   :  { %24 = vadd.xlane.f32.xlu0 %v23_v1 }
  0x7a   :  { %v25_v2 = vpop.xlane.xlu0 %24 }
  0x7b   :  { %v26_v3 = vmax.f32 %v25_v2, 1e-24 }
  0x7d   :  { %45 = vrsqrt.f32 %v26_v3  ;;  %vm33_vm1 = vweird.f32 %v26_v3 }
  0x83   :  { %v46_v4 = vpop.eup %45 }
  0x84   :  { %v28_v5 = vmul.f32 %v46_v4, %v26_v3  ;;  %vm34_vm0 = vweird.f32 %v46_v4 }
  0x85   :  { %vm35_vm3 = vmor %vm33_vm1, %vm34_vm0 }
  0x86   :  { %v29_v6 = vmul.f32 %v46_v4, %v28_v5 }
  0x88   :  { %v30_v7 = vmul.f32 0.5, %v29_v6 }
  0x8a   :  { %v31_v8 = vsub.f32 1.5, %v30_v7 }
  0x8c   :  { %v32_v9 = vmul.f32 %v46_v4, %v31_v8 }
  0x8e   :  { %v36_v10 = vsel %vm35_vm3, %v46_v4, %v32_v9 }
  0x8f   :  { %38 = vst.msk [vmem:[%s91_s1] sm:$0xff] %vm37_vm2, %v36_v10 }
  0x90   :  { %43 = vsyncpa [#allocation3], 1 }

</bundles_post_ra>
